<compile_context>
chip_gen: v7x
topology: tpu7x:2x2x1
jax: 0.10.0
libtpu: 0.0.40
codegen_flags: <defaults>
</compile_context>

<pallas_src>
import functools
import math

import jax
import jax.numpy as jnp
from jax.experimental import pallas as pl
from jax.experimental.pallas import tpu as pltpu


HIDDEN_SIZE = 64
HIDDEN_LAYERS = 3


def _round_up(v, m):
    return ((v + m - 1) // m) * m


def _mlp_kernel(x_ref, w_in_ref, b_in_ref, w_h_ref, b_h_ref, w_out_ref,
                b_out_ref, o_ref, *, hidden_layers, expand_theta, mxu_bf16):
    """One batch tile. Batch lives on the lane axis.

    x_ref     : (Din, Bt)   input tile (lanes = batch)
    w_in_ref  : (H, F)      input layer weight, PyTorch (out, in) layout
    b_in_ref  : (H, 1)
    w_h_ref   : (L, H, H)   stacked hidden weights
    b_h_ref   : (L, H, 1)
    w_out_ref : (H, 1)      output weight stored as a column
    b_out_ref : (1, 1)
    o_ref     : (1, Bt)
    """
    xt = x_ref[...]
    F = w_in_ref.shape[1]
    cdt = jnp.bfloat16 if mxu_bf16 else jnp.float32

    # ---- Input layer --------------------------------------------------------
    if expand_theta or F <= 8:
        # Tiny fan-in: a K<=8 matmul would waste a full MXU K tile streaming
        # N=Bt columns -> do it as broadcast multiply-adds on the VPU instead.
        if expand_theta:
            theta = xt[2:3, :]                                    # (1, Bt)
            feats = (xt[0:1, :], xt[1:2, :], jnp.sin(theta), jnp.cos(theta))
        else:
            feats = tuple(xt[f:f + 1, :] for f in range(F))
        h = w_in_ref[:, 0:1] * feats[0]                           # (H,1)*(1,Bt)
        for f in range(1, len(feats)):
            h = h + w_in_ref[:, f:f + 1] * feats[f]
        h = h + b_in_ref[...]                                     # (H,1) bcast
    else:
        h = jnp.dot(w_in_ref[...].astype(cdt), xt.astype(cdt),
                    preferred_element_type=jnp.float32) + b_in_ref[...]

    # ---- Hidden layers: tanh(W @ h + b) -------------------------------------
    # bf16 MXU operands, f32 accumulation; bias add & tanh stay f32.
    # (Further knob for v6e/v7x only: keep h bf16 between layers -> ~2x EUP
    #  tanh and halved vreg footprint; not applied to stay v5e-safe.)
    for i in range(hidden_layers):
        pre = jnp.dot(w_h_ref[i].astype(cdt), h.astype(cdt),
                      preferred_element_type=jnp.float32) + b_h_ref[i]
        h = jnp.tanh(pre)

    # ---- Output layer on the VPU/XLU (keep the M=1 row off the MXU) ---------
    o_ref[...] = (jnp.sum(w_out_ref[...] * h, axis=0, keepdims=True)
                  + b_out_ref[...])


def _pick_block_b(B, block_b):
    bb = max(_round_up(block_b, 128), 128)
    if B <= 128:
        return 128
    # Guarantee >= 2 grid steps so the "parallel" batch axis can shard across
    # both TensorCores on v7x (no effect on single-TC v5e/v6e).
    return min(bb, _round_up(-(-B // 2), 128))


def mlp_pallas(x, params, *, block_b=512, mxu_bf16=True):
    """MLP forward with the hot path in a single Pallas kernel.

    x: (B, input_dim) float32.  If input_dim == 3, theta (last column) is
    expanded to [sin, cos] inside the kernel, matching the PyTorch forward.
    Returns (B, 1) float32.
    """
    x = x.astype(jnp.float32)
    w_in, b_in, w_h, b_h, w_out, b_out = params

    B, Din = x.shape
    expand_theta = (Din == 3)
    H, F = w_in.shape
    L = w_h.shape[0]

    # Batch-on-lane layout (Din, B); the only wrapper-side data-movement op.
    # TODO(synk): fold this tiny transpose into the kernel (in-kernel XLU
    # transpose of the (bb, Din) tile) to shave ~1-2 us off the small-batch
    # latency path.
    xt = x.T

    bb = _pick_block_b(B, block_b)
    grid = (pl.cdiv(B, bb),)

    kernel = functools.partial(_mlp_kernel, hidden_layers=L,
                               expand_theta=expand_theta, mxu_bf16=mxu_bf16)

    out = pl.pallas_call(
        kernel,
        out_shape=jax.ShapeDtypeStruct((1, B), jnp.float32),
        grid_spec=pltpu.PrefetchScalarGridSpec(
            num_scalar_prefetch=0,
            grid=grid,
            in_specs=[
                pl.BlockSpec((Din, bb), lambda i: (0, i)),      # x tile
                pl.BlockSpec((H, F), lambda i: (0, 0)),         # w_in (out,in)
                pl.BlockSpec((H, 1), lambda i: (0, 0)),         # b_in
                pl.BlockSpec((L, H, H), lambda i: (0, 0, 0)),   # hidden W stack
                pl.BlockSpec((L, H, 1), lambda i: (0, 0, 0)),   # hidden b stack
                pl.BlockSpec((H, 1), lambda i: (0, 0)),         # w_out column
                pl.BlockSpec((1, 1), lambda i: (0, 0)),         # b_out
            ],
            out_specs=pl.BlockSpec((1, bb), lambda i: (0, i)),
        ),
        compiler_params=pltpu.CompilerParams(
            dimension_semantics=("parallel",)),
    )(xt, w_in, b_in, w_h, b_h, w_out, b_out)

    # (1, B) -> (B, 1): identical linear order, metadata-only reshape.
    return out.reshape(B, 1)


def init_params(key, input_dim, hidden_size=HIDDEN_SIZE,
                hidden_layers=HIDDEN_LAYERS):
    """Deterministic init mimicking torch.nn.Linear (U(-1/sqrt(fan_in), +)).

    Weights use the PyTorch-native (out, in) layout except w_out, which is
    stored as an (H, 1) column so the kernel's VPU output layer can use it
    directly; biases are (out, 1) columns (broadcast along the lane axis).
    """
    in_features = input_dim if input_dim != 3 else input_dim + 1

    def linear(k, fan_in, fan_out):
        kw, kb = jax.random.split(k)
        bound = 1.0 / math.sqrt(fan_in)
        w = jax.random.uniform(kw, (fan_out, fan_in), jnp.float32,
                               -bound, bound)
        b = jax.random.uniform(kb, (fan_out, 1), jnp.float32, -bound, bound)
        return w, b

    keys = jax.random.split(key, 2 + hidden_layers)
    w_in, b_in = linear(keys[0], in_features, hidden_size)

    w_h_list, b_h_list = [], []
    for l in range(hidden_layers):
        w, b = linear(keys[1 + l], hidden_size, hidden_size)
        w_h_list.append(w)
        b_h_list.append(b)
    w_h = jnp.stack(w_h_list, axis=0)            # (L, H, H)
    b_h = jnp.stack(b_h_list, axis=0)            # (L, H, 1)

    w_out_t, b_out = linear(keys[-1], hidden_size, 1)   # torch layout (1, H)
    w_out = w_out_t.T                                   # stored as (H, 1)
    return (w_in, b_in, w_h, b_h, w_out, b_out)


def mlp_reference(x, params):
    """Pure-JAX reference for correctness checking."""
    x = x.astype(jnp.float32)
    if x.shape[-1] == 3:
        x = jnp.concatenate(
            [x[..., :-1], jnp.sin(x[..., -1:]), jnp.cos(x[..., -1:])], axis=-1)
    w_in, b_in, w_h, b_h, w_out, b_out = params
    h = x @ w_in.T + b_in[:, 0]
    for i in range(w_h.shape[0]):
        h = jnp.tanh(h @ w_h[i].T + b_h[i, :, 0])
    return h @ w_out + b_out[:, 0]               # w_out is (H, 1)


if __name__ == "__main__":
    key = jax.random.PRNGKey(0)
    k_x1, k_p1, k_x2, k_x3, k_p3, k_x4, k_p4 = jax.random.split(key, 7)

    # Case 1: NMPC state (x, y, theta), tiny batch, exact f32 MXU path.
    x1 = jax.random.normal(k_x1, (8, 3), dtype=jnp.float32)
    p1 = init_params(k_p1, 3)
    out1 = jax.block_until_ready(mlp_pallas(x1, p1, mxu_bf16=False))
    ref1 = mlp_reference(x1, p1)
    assert out1.shape == (8, 1), out1.shape
    assert jnp.allclose(out1, ref1, atol=1e-4, rtol=1e-4), (
        float(jnp.max(jnp.abs(out1 - ref1))))

    # Case 2: ragged batch -> 2 "parallel" grid steps + masked last block,
    #         default bf16 MXU operands (loosened tolerance).
    x2 = jax.random.normal(k_x2, (300, 3), dtype=jnp.float32)
    out2 = jax.block_until_ready(mlp_pallas(x2, p1))
    ref2 = mlp_reference(x2, p1)
    assert out2.shape == (300, 1), out2.shape
    assert jnp.allclose(out2, ref2, atol=2e-2, rtol=2e-2), (
        float(jnp.max(jnp.abs(out2 - ref2))))

    # Case 3: input_dim != 3, small fan-in VPU input layer, exact f32 path.
    x3 = jax.random.normal(k_x3, (16, 5), dtype=jnp.float32)
    p3 = init_params(k_p3, 5)
    out3 = jax.block_until_ready(mlp_pallas(x3, p3, mxu_bf16=False))
    ref3 = mlp_reference(x3, p3)
    assert out3.shape == (16, 1), out3.shape
    assert jnp.allclose(out3, ref3, atol=1e-4, rtol=1e-4), (
        float(jnp.max(jnp.abs(out3 - ref3))))

    # Case 4: fan-in > 8 exercises the MXU input-layer branch (bf16).
    x4 = jax.random.normal(k_x4, (64, 12), dtype=jnp.float32)
    p4 = init_params(k_p4, 12)
    out4 = jax.block_until_ready(mlp_pallas(x4, p4))
    ref4 = mlp_reference(x4, p4)
    assert out4.shape == (64, 1), out4.shape
    assert jnp.allclose(out4, ref4, atol=2e-2, rtol=2e-2), (
        float(jnp.max(jnp.abs(out4 - ref4))))

    print("KERNEL_OK")
</pallas_src>

<mosaic_0001>
module attributes {stable_mosaic.version = 11 : i64} {
  func.func @_mlp_kernel(%arg0: i32, %arg1: memref<3x128xf32, #tpu.memory_space<vmem>>, %arg2: memref<64x4xf32, #tpu.memory_space<vmem>>, %arg3: memref<64x1xf32, #tpu.memory_space<vmem>>, %arg4: memref<3x64x64xf32, #tpu.memory_space<vmem>>, %arg5: memref<3x64x1xf32, #tpu.memory_space<vmem>>, %arg6: memref<64x1xf32, #tpu.memory_space<vmem>>, %arg7: memref<1x1xf32, #tpu.memory_space<vmem>>, %arg8: memref<1x128xf32, #tpu.memory_space<vmem>>) attributes {dimension_semantics = [#tpu.dimension_semantics<parallel>], iteration_bounds = array<i64: 1>, scalar_prefetch = 0 : i64, scratch_operands = 0 : i64, tpu.core_type = #tpu.core_type<tc>, window_params = [{transform_indices = @transform_0, window_bounds = array<i64: 3, 128>}, {pipeline_mode = #tpu.pipeline_mode<synchronous>, transform_indices = @transform_1, window_bounds = array<i64: 64, 4>}, {pipeline_mode = #tpu.pipeline_mode<synchronous>, transform_indices = @transform_2, window_bounds = array<i64: 64, 1>}, {pipeline_mode = #tpu.pipeline_mode<synchronous>, transform_indices = @transform_3, window_bounds = array<i64: 3, 64, 64>}, {pipeline_mode = #tpu.pipeline_mode<synchronous>, transform_indices = @transform_4, window_bounds = array<i64: 3, 64, 1>}, {pipeline_mode = #tpu.pipeline_mode<synchronous>, transform_indices = @transform_5, window_bounds = array<i64: 64, 1>}, {pipeline_mode = #tpu.pipeline_mode<synchronous>, transform_indices = @transform_6, window_bounds = array<i64: 1, 1>}, {transform_indices = @transform_7, window_bounds = array<i64: 1, 128>}]} {
    %c0 = arith.constant 0 : index
    %c0_0 = arith.constant 0 : index
    %0 = vector.load %arg1[%c0, %c0_0] : memref<3x128xf32, #tpu.memory_space<vmem>>, vector<3x128xf32>
    %1 = vector.extract_strided_slice %0 {offsets = [2, 0], sizes = [1, 128], strides = [1, 1]} : vector<3x128xf32> to vector<1x128xf32>
    %2 = vector.extract_strided_slice %0 {offsets = [0, 0], sizes = [1, 128], strides = [1, 1]} : vector<3x128xf32> to vector<1x128xf32>
    %3 = vector.extract_strided_slice %0 {offsets = [1, 0], sizes = [1, 128], strides = [1, 1]} : vector<3x128xf32> to vector<1x128xf32>
    %4 = math.sin %1 : vector<1x128xf32>
    %5 = math.cos %1 : vector<1x128xf32>
    %c0_1 = arith.constant 0 : index
    %c0_2 = arith.constant 0 : index
    %6 = vector.load %arg2[%c0_1, %c0_2] : memref<64x4xf32, #tpu.memory_space<vmem>>, vector<64x1xf32>
    %7 = vector.broadcast %6 : vector<64x1xf32> to vector<64x128xf32>
    %8 = vector.broadcast %2 : vector<1x128xf32> to vector<64x128xf32>
    %9 = arith.mulf %7, %8 : vector<64x128xf32>
    %c0_3 = arith.constant 0 : index
    %c1 = arith.constant 1 : index
    %10 = vector.load %arg2[%c0_3, %c1] : memref<64x4xf32, #tpu.memory_space<vmem>>, vector<64x1xf32>
    %11 = vector.broadcast %10 : vector<64x1xf32> to vector<64x128xf32>
    %12 = vector.broadcast %3 : vector<1x128xf32> to vector<64x128xf32>
    %13 = arith.mulf %11, %12 : vector<64x128xf32>
    %14 = arith.addf %9, %13 : vector<64x128xf32>
    %c0_4 = arith.constant 0 : index
    %c2 = arith.constant 2 : index
    %15 = vector.load %arg2[%c0_4, %c2] : memref<64x4xf32, #tpu.memory_space<vmem>>, vector<64x1xf32>
    %16 = vector.broadcast %15 : vector<64x1xf32> to vector<64x128xf32>
    %17 = vector.broadcast %4 : vector<1x128xf32> to vector<64x128xf32>
    %18 = arith.mulf %16, %17 : vector<64x128xf32>
    %19 = arith.addf %14, %18 : vector<64x128xf32>
    %c0_5 = arith.constant 0 : index
    %c3 = arith.constant 3 : index
    %20 = vector.load %arg2[%c0_5, %c3] : memref<64x4xf32, #tpu.memory_space<vmem>>, vector<64x1xf32>
    %21 = vector.broadcast %20 : vector<64x1xf32> to vector<64x128xf32>
    %22 = vector.broadcast %5 : vector<1x128xf32> to vector<64x128xf32>
    %23 = arith.mulf %21, %22 : vector<64x128xf32>
    %24 = arith.addf %19, %23 : vector<64x128xf32>
    %c0_6 = arith.constant 0 : index
    %c0_7 = arith.constant 0 : index
    %25 = vector.load %arg3[%c0_6, %c0_7] : memref<64x1xf32, #tpu.memory_space<vmem>>, vector<64x1xf32>
    %26 = vector.broadcast %25 : vector<64x1xf32> to vector<64x128xf32>
    %27 = arith.addf %24, %26 : vector<64x128xf32>
    %c0_8 = arith.constant 0 : index
    %c0_9 = arith.constant 0 : index
    %c0_10 = arith.constant 0 : index
    %28 = vector.load %arg4[%c0_8, %c0_9, %c0_10] : memref<3x64x64xf32, #tpu.memory_space<vmem>>, vector<1x64x64xf32>
    %29 = vector.shape_cast %28 : vector<1x64x64xf32> to vector<64x64xf32>
    %cst = arith.constant dense<0.000000e+00> : vector<64x128xf32>
    %30 = tpu.matmul %29, %27, %cst {dimension_numbers = #tpu.dot_dimension_numbers<[1], [0], [0], [1], [0, 0, 1, 1], [], []>} : vector<64x64xf32>, vector<64x128xf32>, vector<64x128xf32> -> vector<64x128xf32>
    %c0_11 = arith.constant 0 : index
    %c0_12 = arith.constant 0 : index
    %c0_13 = arith.constant 0 : index
    %31 = vector.load %arg5[%c0_11, %c0_12, %c0_13] : memref<3x64x1xf32, #tpu.memory_space<vmem>>, vector<1x64x1xf32>
    %32 = vector.shape_cast %31 : vector<1x64x1xf32> to vector<64x1xf32>
    %33 = vector.broadcast %32 : vector<64x1xf32> to vector<64x128xf32>
    %34 = arith.addf %30, %33 : vector<64x128xf32>
    %35 = math.tanh %34 : vector<64x128xf32>
    %c1_14 = arith.constant 1 : index
    %c0_15 = arith.constant 0 : index
    %c0_16 = arith.constant 0 : index
    %36 = vector.load %arg4[%c1_14, %c0_15, %c0_16] : memref<3x64x64xf32, #tpu.memory_space<vmem>>, vector<1x64x64xf32>
    %37 = vector.shape_cast %36 : vector<1x64x64xf32> to vector<64x64xf32>
    %cst_17 = arith.constant dense<0.000000e+00> : vector<64x128xf32>
    %38 = tpu.matmul %37, %35, %cst_17 {dimension_numbers = #tpu.dot_dimension_numbers<[1], [0], [0], [1], [0, 0, 1, 1], [], []>} : vector<64x64xf32>, vector<64x128xf32>, vector<64x128xf32> -> vector<64x128xf32>
    %c1_18 = arith.constant 1 : index
    %c0_19 = arith.constant 0 : index
    %c0_20 = arith.constant 0 : index
    %39 = vector.load %arg5[%c1_18, %c0_19, %c0_20] : memref<3x64x1xf32, #tpu.memory_space<vmem>>, vector<1x64x1xf32>
    %40 = vector.shape_cast %39 : vector<1x64x1xf32> to vector<64x1xf32>
    %41 = vector.broadcast %40 : vector<64x1xf32> to vector<64x128xf32>
    %42 = arith.addf %38, %41 : vector<64x128xf32>
    %43 = math.tanh %42 : vector<64x128xf32>
    %c2_21 = arith.constant 2 : index
    %c0_22 = arith.constant 0 : index
    %c0_23 = arith.constant 0 : index
    %44 = vector.load %arg4[%c2_21, %c0_22, %c0_23] : memref<3x64x64xf32, #tpu.memory_space<vmem>>, vector<1x64x64xf32>
    %45 = vector.shape_cast %44 : vector<1x64x64xf32> to vector<64x64xf32>
    %cst_24 = arith.constant dense<0.000000e+00> : vector<64x128xf32>
    %46 = tpu.matmul %45, %43, %cst_24 {dimension_numbers = #tpu.dot_dimension_numbers<[1], [0], [0], [1], [0, 0, 1, 1], [], []>} : vector<64x64xf32>, vector<64x128xf32>, vector<64x128xf32> -> vector<64x128xf32>
    %c2_25 = arith.constant 2 : index
    %c0_26 = arith.constant 0 : index
    %c0_27 = arith.constant 0 : index
    %47 = vector.load %arg5[%c2_25, %c0_26, %c0_27] : memref<3x64x1xf32, #tpu.memory_space<vmem>>, vector<1x64x1xf32>
    %48 = vector.shape_cast %47 : vector<1x64x1xf32> to vector<64x1xf32>
    %49 = vector.broadcast %48 : vector<64x1xf32> to vector<64x128xf32>
    %50 = arith.addf %46, %49 : vector<64x128xf32>
    %51 = math.tanh %50 : vector<64x128xf32>
    %c0_28 = arith.constant 0 : index
    %c0_29 = arith.constant 0 : index
    %52 = vector.load %arg6[%c0_28, %c0_29] : memref<64x1xf32, #tpu.memory_space<vmem>>, vector<64x1xf32>
    %53 = vector.broadcast %52 : vector<64x1xf32> to vector<64x128xf32>
    %54 = arith.mulf %53, %51 : vector<64x128xf32>
    %cst_30 = arith.constant dense<0.000000e+00> : vector<128xf32>
    %55 = vector.multi_reduction <add>, %54, %cst_30 [0] : vector<64x128xf32> to vector<128xf32>
    %56 = vector.shape_cast %55 : vector<128xf32> to vector<1x128xf32>
    %c0_31 = arith.constant 0 : index
    %c0_32 = arith.constant 0 : index
    %57 = vector.load %arg7[%c0_31, %c0_32] : memref<1x1xf32, #tpu.memory_space<vmem>>, vector<1x1xf32>
    %58 = vector.broadcast %57 : vector<1x1xf32> to vector<1x128xf32>
    %59 = arith.addf %56, %58 : vector<1x128xf32>
    %c0_33 = arith.constant 0 : index
    %c0_34 = arith.constant 0 : index
    %60 = vector.load %arg8[%c0_33, %c0_34] : memref<1x128xf32, #tpu.memory_space<vmem>>, vector<1x128xf32>
    tpu.vector_store %arg8[%c0_33, %c0_34], %59 {strides = array<i32>} : memref<1x128xf32, #tpu.memory_space<vmem>>, vector<1x128xf32>,
    return
  }
  func.func @transform_0(%arg0: i32) -> (i32, i32) {
    %c0_i32 = arith.constant 0 : i32
    %c0_i32_0 = arith.constant 0 : i32
    return %c0_i32, %arg0 : i32, i32
  }
  func.func @transform_1(%arg0: i32) -> (i32, i32) {
    %c0_i32 = arith.constant 0 : i32
    %c0_i32_0 = arith.constant 0 : i32
    %c0_i32_1 = arith.constant 0 : i32
    return %c0_i32, %c0_i32_0 : i32, i32
  }
  func.func @transform_2(%arg0: i32) -> (i32, i32) {
    %c0_i32 = arith.constant 0 : i32
    %c0_i32_0 = arith.constant 0 : i32
    %c0_i32_1 = arith.constant 0 : i32
    return %c0_i32, %c0_i32_0 : i32, i32
  }
  func.func @transform_3(%arg0: i32) -> (i32, i32, i32) {
    %c0_i32 = arith.constant 0 : i32
    %c0_i32_0 = arith.constant 0 : i32
    %c0_i32_1 = arith.constant 0 : i32
    %c0_i32_2 = arith.constant 0 : i32
    return %c0_i32, %c0_i32_0, %c0_i32_1 : i32, i32, i32
  }
  func.func @transform_4(%arg0: i32) -> (i32, i32, i32) {
    %c0_i32 = arith.constant 0 : i32
    %c0_i32_0 = arith.constant 0 : i32
    %c0_i32_1 = arith.constant 0 : i32
    %c0_i32_2 = arith.constant 0 : i32
    return %c0_i32, %c0_i32_0, %c0_i32_1 : i32, i32, i32
  }
  func.func @transform_5(%arg0: i32) -> (i32, i32) {
    %c0_i32 = arith.constant 0 : i32
    %c0_i32_0 = arith.constant 0 : i32
    %c0_i32_1 = arith.constant 0 : i32
    return %c0_i32, %c0_i32_0 : i32, i32
  }
  func.func @transform_6(%arg0: i32) -> (i32, i32) {
    %c0_i32 = arith.constant 0 : i32
    %c0_i32_0 = arith.constant 0 : i32
    %c0_i32_1 = arith.constant 0 : i32
    return %c0_i32, %c0_i32_0 : i32, i32
  }
  func.func @transform_7(%arg0: i32) -> (i32, i32) {
    %c0_i32 = arith.constant 0 : i32
    %c0_i32_0 = arith.constant 0 : i32
    return %c0_i32, %arg0 : i32, i32
  }
}

</mosaic_0001>

<bundles_post_ra>
// kernel: tpu_custom_call.1
= control target key start
LH: loop header
LB: loop body
LE: loop exit
PB: predicated region body
PF: predicated region fallthrough
CT: control target
= control target key end

     0   :  { %s2058_s0 = inlined_call_operand.vmem [shape: f32[3,8], index: 0, kind: input, shape index: {}]   ;;  %s2059_s1 = inlined_call_operand.vmem [shape: f32[64,4], index: 1, kind: input, shape index: {}]   ;;  %s2060_s2 = inlined_call_operand.vmem [shape: f32[64,1], index: 2, kind: input, shape index: {}]   ;;  %s2061_s3 = inlined_call_operand.vmem [shape: f32[3,64,64], index: 3, kind: input, shape index: {}]   ;;  %s2062_s4 = inlined_call_operand.vmem [shape: f32[3,64,1], index: 4, kind: input, shape index: {}]   ;;  %s2063_s5 = inlined_call_operand.vmem [shape: f32[64,1], index: 5, kind: input, shape index: {}]   ;;  %s2064_s6 = inlined_call_operand.<no memory space> [shape: f32[1,1], index: 6, kind: input, shape index: {}]   ;;  %s2065_s7 = inlined_call_operand.hbm [shape: f32[1,8], index: 7, kind: output, shape index: {}]  }
   0x1   :  { %v12_v0 = vstv %s2064_s6 }
   0x2   :  { %13 = vst [vmem:[#allocation2] sm:$0x1] %v12_v0 }
   0x3   :  { %v1610_v1 = vld [vmem:[%s2059_s1 + $0x20] sm:$0xff]  ;;  %v1553_v3 = vmov 1   ;;  %v1624_v4 = vld [vmem:[%s2059_s1 + $0x8] sm:$0xff]  ;;  %v1554_v5 = vmov 2   ;;  %v1632_v6 = vld [vmem:[%s2059_s1 + $0x18] sm:$0xff] }
   0x4   :  { %v1615_v2 = vld [vmem:[%s2059_s1] sm:$0xff]  ;;  %1462 = vset.pattern.permute.xlu0 %v1553_v3  ;;  %1455 = vset.pattern.permute.xlu1 %v1553_v3  ;;  %v1646_v9 = vld [vmem:[%s2059_s1 + $0x10] sm:$0xff] }
   0x5   :  { %314 = vperm.xlu0 %1462, %v1610_v1   ;;  %298 = vperm.xlu1 %1455, %v1615_v2   ;;  %v1640_v7 = vld [vmem:[%s2058_s0] sm:$0x7] }
   0x6   :  { %v33_v8 = vand.u32 2139095040, %v1640_v7 }
   0x9   :  { %1463 = vset.pattern.permute.xlu0 %v1554_v5  ;;  %302 = vperm.xlu1 %1455, %v1624_v4  }
   0xa   :  { %350 = vperm.xlu0 %1463, %v1615_v2  }
   0xd   :  { %1456 = vset.pattern.permute.xlu1 %v1554_v5 }
   0xe   :  { %362 = vperm.xlu0 %1463, %v1632_v6   ;;  %354 = vperm.xlu1 %1456, %v1624_v4  }
   0xf   :  { %14 = vsyncpa [#allocation4], 0  ;;  %v34_v10 = vshrl.u32 %v33_v8, 23  ;;  %v1555_v11 = vmov 0   ;;  %v30_v12 = vand.u32 2147483647, %v1640_v7  ;;  %vm122_vm13 = vweird.f32 %v1640_v7 }
  0x10   :  { %v1556_v15 = vmov 3   ;;  %v1557_v22 = vmov 683565275   ;;  %v1558_v24 = vmov 2475754826   ;;  %v1665_v43 = vld [vmem:[%s2059_s1 + $0x30] sm:$0xff] }
  0x11   :  { %v1188_v13 = vadd.s32 4294967169, %v34_v10  ;;  %v37_v16 = vand.u32 8388607, %v30_v12  ;;  %v1559_v26 = vmov 2131351028   ;;  %v242_v8 = vld [vmem:[%s2059_s1 + $0x28] sm:$0xff] }
  0x12   :  { %366 = vperm.xlu0 %1463, %v1610_v1   ;;  %1457 = vset.pattern.permute.xlu1 %v1555_v11  ;;  %v1560_v28 = vmov 2102212464   ;;  %v1561_v30 = vmov 920167782   ;;  %v1562_v37 = vmov 1326507024  }
  0x13   :  { %257 = vperm.xlu1 %1457, %v1646_v9   ;;  %v40_v14 = vadd.s32 1, %v1188_v13  ;;  %v38_v19 = vor.u32 8388608, %v37_v16  ;;  %v1697_v13 = vld [vmem:[%s2059_s1 + $0x38] sm:$0xff]  ;;  %vm32_vm7 = vcmp.lt.s32.totalorder %v1640_v7, 0  ;;  %vm1782_vm8 = vcmp.le.f32.partialorder %v30_v12, 0.7853982 }
  0x14   :  { %vm565_vm9 = vcmask 523264  }
  0x15   :  { %vm41_vm0 = vcmp.gt.s32.totalorder %v40_v14, 0  ;;  %v78_v39 = vshll.u32 %v38_v19, 8 }
  0x16   :  { %1467 = vset.pattern.permute.xlu0 %v1556_v15  ;;  %v42_v17 = vsel %vm41_vm0, %v40_v14, 0 }
  0x17   :  { %402 = vperm.xlu0 %1467, %v1615_v2   ;;  %1458 = vset.pattern.permute.xlu1 %v1553_v3  ;;  %v44_v18 = vand.u32 31, %v42_v17  ;;  %v43_v20 = vshrl.u32 %v42_v17, 5  ;;  %v453_v17 = vld [vmem:[%s2060_s2] sm:$0xff] }
  0x18   :  { %306 = vperm.xlu1 %1458, %v1646_v9  }
  0x19   :  { %v45_v21 = vsub.s32 32, %v44_v18  ;;  %v47_v23 = vshll.u32 %v1557_v22, %v44_v18  ;;  %v50_v25 = vshll.u32 %v1558_v24, %v44_v18  ;;  %v53_v27 = vshll.u32 %v1559_v26, %v44_v18 }
  0x1a   :  { %v56_v29 = vshll.u32 %v1560_v28, %v44_v18  ;;  %v59_v31 = vshll.u32 %v1561_v30, %v44_v18  ;;  %vm62_vm1 = vcmp.lt.s32.totalorder %v43_v20, 1  ;;  %vm65_vm2 = vcmp.lt.s32.totalorder %v43_v20, 4  ;;  %v517_v18 = vld [vmem:[%s2062_s4] sm:$0xff] }
  0x1b   :  { %414 = vperm.xlu0 %1467, %v1632_v6   ;;  %v46_v32 = vshrl.u32 %v1557_v22, %v45_v21  ;;  %v48_v33 = vshrl.u32 %v1558_v24, %v45_v21  ;;  %v51_v34 = vshrl.u32 %v1559_v26, %v45_v21  ;;  %v54_v35 = vshrl.u32 %v1560_v28, %v45_v21  ;;  %v521_v22 = vld [vmem:[%s2062_s4 + $0x20] sm:$0xff]  ;;  %v523_v24 = vld [vmem:[%s2062_s4 + $0x30] sm:$0xff] }
  0x1c   :  { %310 = vperm.xlu1 %1458, %v1632_v6   ;;  %v57_v36 = vshrl.u32 %v1561_v30, %v45_v21  ;;  %v60_v38 = vshrl.u32 %v1562_v37, %v45_v21  ;;  %vm63_vm3 = vcmp.lt.s32.totalorder %v43_v20, 2  ;;  %vm64_vm4 = vcmp.lt.s32.totalorder %v43_v20, 3  ;;  %v519_v20 = vld [vmem:[%s2062_s4 + $0x10] sm:$0xff]  ;;  %v1212_v26 = vld [vmem:[%s2062_s4 + $0x40] sm:$0xff] }
  0x1d   :  { %v49_v40 = vor.u32 %v48_v33, %v47_v23  ;;  %v52_v41 = vor.u32 %v51_v34, %v50_v25  ;;  %v55_v42 = vor.u32 %v54_v35, %v53_v27  ;;  %v1214_v28 = vld [vmem:[%s2062_s4 + $0x50] sm:$0xff]  ;;  %v1216_v30 = vld [vmem:[%s2062_s4 + $0x60] sm:$0xff] }
  0x1e   :  { %v58_v44 = vor.u32 %v57_v36, %v56_v29  ;;  %v61_v45 = vor.u32 %v60_v38, %v59_v31  ;;  %v1218_v33 = vld [vmem:[%s2062_s4 + $0x70] sm:$0xff]  ;;  %v1236_v38 = vld [vmem:[%s2062_s4 + $0x80] sm:$0xff] }
  0x1f   :  { %418 = vperm.xlu0 %1467, %v1610_v1   ;;  %v66_v46 = vsel %vm62_vm1, %v46_v32, %v49_v40  ;;  %v67_v47 = vsel %vm65_vm2, %v55_v42, 2102212464  ;;  %v70_v48 = vsel %vm62_vm1, %v49_v40, %v52_v41  ;;  %v74_v49 = vsel %vm62_vm1, %v52_v41, %v55_v42  ;;  %v455_v37 = vld [vmem:[%s2060_s2 + $0x10] sm:$0xff] }
  0x20   :  { %1459 = vset.pattern.permute.xlu1 %v1556_v15  ;;  %v68_v50 = vsel %vm64_vm4, %v52_v41, %v67_v47  ;;  %v71_v51 = vsel %vm65_vm2, %v58_v44, 920167782  ;;  %v75_v52 = vsel %vm65_vm2, %v61_v45, 1326507024  ;;  %v1238_v41 = vld [vmem:[%s2062_s4 + $0x90] sm:$0xff]  ;;  %v1240_v45 = vld [vmem:[%s2062_s4 + $0xa0] sm:$0xff] }
  0x21   :  { %406 = vperm.xlu1 %1459, %v1624_v4   ;;  %v72_v53 = vsel %vm64_vm4, %v55_v42, %v71_v51  ;;  %v76_v54 = vsel %vm64_vm4, %v58_v44, %v75_v52  ;;  %v69_v55 = vsel %vm63_vm3, %v66_v46, %v68_v50  ;;  %v1242_v47 = vld [vmem:[%s2062_s4 + $0xb0] sm:$0xff] }
  0x22   :  { %v73_v56 = vsel %vm63_vm3, %v70_v48, %v72_v53  ;;  %v77_v57 = vsel %vm63_vm3, %v74_v49, %v76_v54  ;;  %v85_v62 = vmul.u32 %v78_v39, %v69_v55  ;;  %v1095_v50 = vld [vmem:[%s2063_s5 + $0x10] sm:$0xff]  ;;  %v460_v54 = vld [vmem:[%s2060_s2 + $0x38] sm:$0xff]  ;;  %v285_v55 = vlaneseq }
  0x23   :  { %426 = vperm.xlu0 %1467, %v1665_v43   ;;  %v1673_v58 = vmul.u32.u64.low %v78_v39, %v77_v57  ;;  %v1674_v59 = vmul.u32.u64.high %v78_v39, %v77_v57, %v1673_v58  ;;  %v1676_v60 = vmul.u32.u64.low %v78_v39, %v73_v56  ;;  %v1677_v61 = vmul.u32.u64.high %v78_v39, %v73_v56, %v1676_v60  ;;  %v459_v52 = vld [vmem:[%s2060_s2 + $0x30] sm:$0xff] }
  0x24   :  { %v1099_v56 = vld [vmem:[%s2063_s5 + $0x30] sm:$0xff]  ;;  %v518_v58 = vld [vmem:[%s2062_s4 + $0x8] sm:$0xff] }
  0x25   :  { %1460 = vset.pattern.permute.xlu1 %v1554_v5  ;;  %vm87_vm5 = vc.u32 %v1674_v59, %v1676_v60  ;;  %v88_v63 = vadd.s32 1, %v1677_v61  ;;  %v86_v31 = vadd.s32 %v1676_v60, %v1674_v59  ;;  %v1816_v59 = vshrl.u32 %v285_v55, 7  ;;  %v1094_v55 = vld [vmem:[%s2063_s5 + $0x8] sm:$0xff] }
  0x26   :  { %358 = vperm.xlu1 %1460, %v1646_v9  }
  0x27   :  { %1474 = vset.pattern.permute.xlu0 %v1555_v11  ;;  %v89_v0 = vsel %vm87_vm5, %v88_v63, %v1677_v61  ;;  %v1162_v61 = vld [vmem:[#allocation2] sm:$0x1]  ;;  %v520_v63 = vld [vmem:[%s2062_s4 + $0x18] sm:$0xff] }
  0x28   :  { %247 = vperm.xlu0 %1474, %v1615_v2   ;;  %v90_v10 = vadd.s32 %v89_v0, %v85_v62  ;;  %v331_v0 = vsub.s32 1, %v1816_v59 }
  0x2a   :  { %1461 = vset.pattern.permute.xlu1 %v1555_v11  ;;  %v91_v2 = vadd.s32 536870912, %v90_v10 }
  0x2b   :  { %267 = vperm.xlu1 %1461, %v1610_v1   ;;  %v456_v1 = vld [vmem:[%s2060_s2 + $0x18] sm:$0xff] }
  0x2c   :  { %252 = vperm.xlu0 %1474, %v1624_v4   ;;  %v1699_v14 = vshrl.u32 %v91_v2, 30  ;;  %v509_v2 = vld [vmem:[%s2061_s3] sm:$0xff] }
  0x2d   :  { %1316 = vmatprep.mubr.msk.f32.mxu0 %vm565_vm9, %v509_v2 }
  0x2e   :  { %v93_v4 = vshll.u32 %v1699_v14, 30  ;;  %v116_v51 = vsub.s32 4, %v1699_v14 }
  0x2f   :  { %272 = vperm.xlu1 %1461, %v242_v8  }
  0x30   :  { %262 = vperm.xlu0 %1474, %v1632_v6   ;;  %v458_v6 = vld [vmem:[%s2060_s2 + $0x28] sm:$0xff]  ;;  %v94_v16 = vsub.s32 %v90_v10, %v93_v4  ;;  %v117_v53 = vsel %vm32_vm7, %v116_v51, %v1699_v14 }
  0x31   :  { %v119_v57 = vsel %vm1782_vm8, 0, %v117_v53  ;;  %v522_v14 = vld [vmem:[%s2062_s4 + $0x28] sm:$0xff] }
  0x32   :  { %v96_v19 = vsub.s32 0, %v94_v16  ;;  %v123_v60 = vadd.s32 3, %v119_v57 }
  0x33   :  { %1464 = vset.pattern.permute.xlu1 %v1553_v3 }
  0x34   :  { %282 = vperm.xlu0 %1474, %v1697_v13   ;;  %318 = vperm.xlu1 %1464, %v242_v8   ;;  %v1189_v21 = vmin.u32 %v96_v19, %v94_v16  ;;  %v124_v10 = vand.u32 3, %v123_v60 }
  0x36   :  { %v98_v23 = vclz %v1189_v21  ;;  %vm126_vm10 = vcmp.eq.s32.totalorder %v124_v10, 0  ;;  %vm129_vm11 = vcmp.eq.s32.totalorder %v124_v10, 2  ;;  %vm125_vm12 = vcmp.lt.s32.totalorder %v124_v10, 2 }
  0x38   :  { %478 = vperm.xlu0 %1474, %v456_v1   ;;  %1465 = vset.pattern.permute.xlu1 %v1556_v15  ;;  %v1190_v25 = vadd.s32 4294967294, %v98_v23  ;;  %v1213_v23 = vld [vmem:[%s2062_s4 + $0x48] sm:$0xff] }
  0x39   :  { %410 = vperm.xlu1 %1465, %v1646_v9   ;;  %v454_v9 = vld [vmem:[%s2060_s2 + $0x8] sm:$0xff] }
  0x3a   :  { %vm1191_vm6 = vcmp.lt.s32.totalorder %v1190_v25, 0 }
  0x3b   :  { %v101_v27 = vsel %vm1191_vm6, 0, %v1190_v25 }
  0x3c   :  { %488 = vperm.xlu0 %1474, %v458_v6   ;;  %v106_v29 = vsub.s32 4294967266, %v101_v27  ;;  %v102_v32 = vsub.s32 32, %v101_v27  ;;  %v103_v34 = vshll.u32 %v94_v16, %v101_v27 }
  0x3d   :  { %1466 = vset.pattern.permute.xlu1 %v1555_v11 }
  0x3e   :  { %463 = vperm.xlu1 %1466, %v453_v17   ;;  %v104_v35 = vshrl.u32 %v86_v31, %v102_v32 }
  0x40   :  { %527 = vperm.xlu0 %1474, %v517_v18   ;;  %v105_v39 = vor.u32 %v104_v35, %v103_v34  ;;  %v524_v18 = vld [vmem:[%s2062_s4 + $0x38] sm:$0xff] }
  0x42   :  { %468 = vperm.xlu1 %1466, %v454_v9   ;;  %v112_v44 = vcvt.s32.f32 %v105_v39  ;;  %v1219_v39 = vld [vmem:[%s2062_s4 + $0x78] sm:$0xff] }
  0x44   :  { %537 = vperm.xlu0 %1474, %v519_v20  }
  0x46   :  { %1468 = vset.pattern.permute.xlu1 %v1554_v5 }
  0x47   :  { %370 = vperm.xlu1 %1468, %v242_v8  }
  0x48   :  { %547 = vperm.xlu0 %1474, %v521_v22  }
  0x4b   :  { %1469 = vset.pattern.permute.xlu1 %v1555_v11 }
  0x4c   :  { %557 = vperm.xlu0 %1474, %v523_v24   ;;  %277 = vperm.xlu1 %1469, %v1665_v43   ;;  %v383_v24 = vsub.s32 2, %v1816_v59 }
  0x50   :  { %723 = vperm.xlu0 %1474, %v1212_v26   ;;  %1470 = vset.pattern.permute.xlu1 %v1553_v3  ;;  %v107_v3 = vadd.s32 127, %v106_v29  ;;  %v1215_v29 = vld [vmem:[%s2062_s4 + $0x58] sm:$0xff] }
  0x51   :  { %322 = vperm.xlu1 %1470, %v1665_v43  }
  0x52   :  { %v108_v36 = vshll.u32 %v107_v3, 23 }
  0x54   :  { %733 = vperm.xlu0 %1474, %v1214_v28   ;;  %v109_v40 = vor.u32 4788187, %v108_v36  ;;  %v227_v28 = vand.u32 3, %v119_v57 }
  0x55   :  { %326 = vperm.xlu1 %1470, %v1697_v13  }
  0x56   :  { %v110_v42 = vand.u32 2147483647, %v109_v40  ;;  %vm229_vm14 = vcmp.eq.s32.totalorder %v227_v28, 0  ;;  %vm232_vm15 = vcmp.eq.s32.totalorder %v227_v28, 2  ;;  %vm228_vm0 = vcmp.lt.s32.totalorder %v227_v28, 2 }
  0x58   :  { %743 = vperm.xlu0 %1474, %v1216_v30   ;;  %v113_v46 = vmul.f32 %v112_v44, %v110_v42  ;;  %v1237_v44 = vld [vmem:[%s2062_s4 + $0x88] sm:$0xff] }
  0x59   :  { %1471 = vset.pattern.permute.xlu1 %v1556_v15 }
  0x5a   :  { %422 = vperm.xlu1 %1471, %v242_v8   ;;  %v114_v48 = vxor.u32 2147483648, %v113_v46 }
  0x5c   :  { %753 = vperm.xlu0 %1474, %v1218_v33   ;;  %v1217_v33 = vld [vmem:[%s2062_s4 + $0x68] sm:$0xff] }
  0x5e   :  { %1472 = vset.pattern.permute.xlu1 %v1555_v11 }
  0x5f   :  { %473 = vperm.xlu1 %1472, %v455_v37  }
  0x60   :  { %918 = vperm.xlu0 %1474, %v1236_v38  }
  0x63   :  { %1473 = vset.pattern.permute.xlu1 %v1554_v5  ;;  %v1093_v5 = vld [vmem:[%s2063_s5] sm:$0xff] }
  0x64   :  { %928 = vperm.xlu0 %1474, %v1238_v41   ;;  %374 = vperm.xlu1 %1473, %v1665_v43   ;;  %v457_v43 = vld [vmem:[%s2060_s2 + $0x20] sm:$0xff] }
  0x68   :  { %938 = vperm.xlu0 %1474, %v1240_v45   ;;  %378 = vperm.xlu1 %1473, %v1697_v13  }
  0x6c   :  { %948 = vperm.xlu0 %1474, %v1242_v47   ;;  %1475 = vset.pattern.permute.xlu1 %v1556_v15  ;;  %v115_v15 = vsel %vm32_vm7, %v114_v48, %v113_v46  ;;  %v1239_v48 = vld [vmem:[%s2062_s4 + $0x98] sm:$0xff] }
  0x6d   :  { %430 = vperm.xlu1 %1475, %v1697_v13   ;;  %v118_v12 = vsel %vm1782_vm8, %v1640_v7, %v115_v15  ;;  %v1827_v13 = vrot.slane %v1640_v7, %v331_v0  ;;  %v1241_v15 = vld [vmem:[%s2062_s4 + $0xa8] sm:$0xff] }
  0x6e   :  { %1477 = vcosq.f32 %v118_v12 }
  0x6f   :  { %1479 = vsinq.f32 %v118_v12  ;;  %v1243_v12 = vld [vmem:[%s2062_s4 + $0xb8] sm:$0xff] }
  0x70   :  { %1103 = vperm.xlu0 %1474, %v1093_v5  }
  0x71   :  { %1476 = vset.pattern.permute.xlu1 %v1555_v11  ;;  %v1097_v11 = vld [vmem:[%s2063_s5 + $0x20] sm:$0xff] }
  0x72   :  { %483 = vperm.xlu1 %1476, %v457_v43  }
  0x74   :  { %1113 = vperm.xlu0 %1474, %v1095_v50   ;;  %v287_v50 = vsub.s32 0, %v1816_v59 }
  0x76   :  { %493 = vperm.xlu1 %1476, %v459_v52   ;;  %v1895_v52 = vrot.slane %v1640_v7, %v287_v50 }
  0x78   :  { %1123 = vperm.xlu0 %1474, %v1097_v11   ;;  %v1478_v62 = vpop.eup %1477 }
  0x79   :  { %v1480_v8 = vpop.eup %1479  ;;  %v130_v4 = vxor.u32 2147483648, %v1478_v62 }
  0x7a   :  { %498 = vperm.xlu1 %1476, %v460_v54   ;;  %v127_v1 = vxor.u32 2147483648, %v1480_v8 }
  0x7b   :  { %v131_v9 = vsel %vm129_vm11, %v130_v4, %v1480_v8  ;;  %v234_v35 = vsel %vm232_vm15, %v130_v4, %v1480_v8 }
  0x7c   :  { %1133 = vperm.xlu0 %1474, %v1099_v56   ;;  %v128_v19 = vsel %vm126_vm10, %v1478_v62, %v127_v1  ;;  %v231_v34 = vsel %vm229_vm14, %v1478_v62, %v127_v1 }
  0x7d   :  { %v132_v22 = vsel %vm125_vm12, %v128_v19, %v131_v9  ;;  %v235_v37 = vsel %vm228_vm0, %v231_v34, %v234_v35 }
  0x7e   :  { %532 = vperm.xlu1 %1476, %v518_v58   ;;  %v133_v25 = vsel %vm122_vm13, nan, %v132_v22  ;;  %v236_v40 = vsel %vm122_vm13, nan, %v235_v37  ;;  %v1096_v58 = vld [vmem:[%s2063_s5 + $0x18] sm:$0xff] }
  0x7f   :  { %v1856_v30 = vrot.slane %v133_v25, %v383_v24  ;;  %v1876_v45 = vrot.slane %v236_v40, %v383_v24 }
  0x80   :  { %1165 = vperm.xlu0 %1474, %v1162_v61  }
  0x82   :  { %542 = vperm.xlu1 %1476, %v520_v63   ;;  %v1098_v63 = vld [vmem:[%s2063_s5 + $0x28] sm:$0xff] }
  0x84   :  { %v1832_v6 = vpop.permute.xlu1 %298  ;;  %v315_v16 = vpop.permute.xlu0 %314 }
  0x85   :  { %v337_v17 = vmul.f32 %v1827_v13, %v315_v16  ;;  %v333_v10 = vmul.f32 %v1827_v13, %v1832_v6 }
  0x86   :  { %552 = vperm.xlu1 %1476, %v522_v14   ;;  %v1100_v14 = vld [vmem:[%s2063_s5 + $0x38] sm:$0xff] }
  0x88   :  { %v1838_v20 = vpop.permute.xlu1 %302 }
  0x89   :  { %v1840_v21 = vpop.permute.xlu0 %350  ;;  %v334_v2 = vmul.f32 %v1827_v13, %v1838_v20 }
  0x8a   :  { %562 = vperm.xlu1 %1476, %v524_v18   ;;  %v385_v1 = vmul.f32 %v1856_v30, %v1840_v21 }
  0x8d   :  { %v1849_v26 = vpop.permute.xlu1 %354  ;;  %v1851_v27 = vpop.permute.xlu0 %362 }
  0x8e   :  { %728 = vperm.xlu1 %1476, %v1213_v23   ;;  %v386_v18 = vmul.f32 %v1856_v30, %v1849_v26 }
  0x91   :  { %v367_v31 = vpop.permute.xlu0 %366 }
  0x92   :  { %738 = vperm.xlu1 %1476, %v1215_v29   ;;  %v1858_v32 = vpop.permute.xlu1 %257  ;;  %v389_v3 = vmul.f32 %v1856_v30, %v367_v31 }
  0x96   :  { %748 = vperm.xlu1 %1476, %v1217_v33   ;;  %v403_v36 = vpop.permute.xlu0 %402 }
  0x97   :  { %v1864_v38 = vpop.permute.xlu1 %306  ;;  %v437_v6 = vmul.f32 %v1876_v45, %v403_v36  ;;  %v388_v36 = vmul.f32 %v1856_v30, %v1851_v27 }
  0x98   :  { %v335_v40 = vmul.f32 %v1827_v13, %v1864_v38 }
  0x9a   :  { %758 = vperm.xlu1 %1476, %v1219_v39   ;;  %v1871_v41 = vpop.permute.xlu0 %414 }
  0x9b   :  { %v311_v42 = vpop.permute.xlu1 %310 }
  0x9c   :  { %v336_v35 = vmul.f32 %v1827_v13, %v311_v42 }
  0x9e   :  { %923 = vperm.xlu1 %1476, %v1237_v44   ;;  %v419_v46 = vpop.permute.xlu0 %418 }
  0x9f   :  { %v441_v47 = vmul.f32 %v1876_v45, %v419_v46  ;;  %v291_v46 = vmul.f32 %v1895_v52, %v1858_v32 }
  0xa0   :  { %v407_v5 = vpop.permute.xlu1 %406 }
  0xa1   :  { %v438_v22 = vmul.f32 %v1876_v45, %v407_v5 }
  0xa2   :  { %933 = vperm.xlu1 %1476, %v1239_v48   ;;  %v427_v43 = vpop.permute.xlu0 %426 }
  0xa3   :  { %v1883_v49 = vmul.f32 %v1876_v45, %v427_v43  ;;  %v343_v43 = vadd.f32 %v335_v40, %v291_v46 }
  0xa5   :  { %v359_v51 = vpop.permute.xlu1 %358 }
  0xa6   :  { %943 = vperm.xlu1 %1476, %v1241_v15   ;;  %v387_v48 = vmul.f32 %v1856_v30, %v359_v51 }
  0xa7   :  { %v248_v53 = vpop.permute.xlu0 %247 }
  0xa8   :  { %v289_v0 = vmul.f32 %v1895_v52, %v248_v53  ;;  %v395_v27 = vadd.f32 %v387_v48, %v343_v43 }
  0xaa   :  { %953 = vperm.xlu1 %1476, %v1243_v12   ;;  %v268_v11 = vpop.permute.xlu1 %267  ;;  %v341_v4 = vadd.f32 %v333_v10, %v289_v0 }
  0xab   :  { %v293_v54 = vmul.f32 %v1895_v52, %v268_v11  ;;  %v253_v7 = vpop.permute.xlu0 %252 }
  0xac   :  { %v290_v8 = vmul.f32 %v1895_v52, %v253_v7  ;;  %v393_v19 = vadd.f32 %v385_v1, %v341_v4 }
  0xad   :  { %v345_v56 = vadd.f32 %v337_v17, %v293_v54 }
  0xae   :  { %1108 = vperm.xlu1 %1476, %v1094_v55   ;;  %v1901_v57 = vpop.permute.xlu1 %272  ;;  %v342_v16 = vadd.f32 %v334_v2, %v290_v8  ;;  %v445_v23 = vadd.f32 %v437_v6, %v393_v19 }
  0xaf   :  { %v397_v60 = vadd.f32 %v389_v3, %v345_v56  ;;  %v263_v33 = vpop.permute.xlu0 %262  ;;  %v294_v8 = vmul.f32 %v1895_v52, %v1901_v57 }
  0xb0   :  { %v394_v9 = vadd.f32 %v386_v18, %v342_v16  ;;  %v292_v26 = vmul.f32 %v1895_v52, %v263_v33  ;;  %v515_v33 = vld [vmem:[%s2061_s3 + $0x30] sm:$0xff] }
  0xb1   :  { %v1906_v61 = vadd.f32 %v441_v47, %v397_v60  ;;  %v440_v47 = vmul.f32 %v1876_v45, %v1871_v41 }
  0xb2   :  { %1118 = vperm.xlu1 %1476, %v1096_v58   ;;  %v446_v24 = vadd.f32 %v438_v22, %v394_v9  ;;  %v344_v37 = vadd.f32 %v336_v35, %v292_v26  ;;  %v516_v26 = vld [vmem:[%s2061_s3 + $0x38] sm:$0xff] }
  0xb3   :  { %v319_v62 = vpop.permute.xlu1 %318  ;;  %v283_v44 = vpop.permute.xlu0 %282 }
  0xb4   :  { %v396_v5 = vadd.f32 %v388_v36, %v344_v37  ;;  %v338_v7 = vmul.f32 %v1827_v13, %v319_v62  ;;  %v296_v18 = vmul.f32 %v1895_v52, %v283_v44 }
  0xb6   :  { %1128 = vperm.xlu1 %1476, %v1098_v63   ;;  %v448_v12 = vadd.f32 %v440_v47, %v396_v5 }
  0xb7   :  { %v479_v11 = vpop.permute.xlu0 %478 }
  0xb8   :  { %v411_v17 = vpop.permute.xlu1 %410  ;;  %v504_v38 = vadd.f32 %v479_v11, %v448_v12 }
  0xb9   :  { %v439_v42 = vmul.f32 %v1876_v45, %v411_v17 }
  0xba   :  { %1138 = vperm.xlu1 %1476, %v1100_v14   ;;  %v346_v14 = vadd.f32 %v338_v7, %v294_v8 }
  0xbb   :  { %v447_v53 = vadd.f32 %v439_v42, %v395_v27  ;;  %v489_v62 = vpop.permute.xlu0 %488 }
  0xbd   :  { %v464_v20 = vpop.permute.xlu1 %463 }
  0xbe   :  { %v501_v28 = vadd.f32 %v464_v20, %v445_v23 }
  0xbf   :  { %v528_v36 = vpop.permute.xlu0 %527 }
  0xc1   :  { %v469_v25 = vpop.permute.xlu1 %468 }
  0xc2   :  { %v502_v29 = vadd.f32 %v469_v25, %v446_v24 }
  0xc3   :  { %v538_v40 = vpop.permute.xlu0 %537 }
  0xc4   :  { %v1384_v21 = vpack.c.bf16 %v502_v29, %v501_v28 }
  0xc6   :  { %v371_v31 = vpop.permute.xlu1 %370  ;;  %1385 = vmatprep.subr.bf16.mxu0 %v1384_v21 }
  0xc7   :  { %1387 = vmatpush3.bf16.msra.mxu0 %v1384_v21  ;;  %v390_v10 = vmul.f32 %v1856_v30, %v371_v31  ;;  %v513_v31 = vld [vmem:[%s2061_s3 + $0x20] sm:$0xff]  ;;  %v548_v27 = vpop.permute.xlu0 %547 }
  0xc9   :  { %v398_v4 = vadd.f32 %v390_v10, %v346_v14 }
  0xcb   :  { %v278_v3 = vpop.permute.xlu1 %277 }
  0xcc   :  { %v295_v58 = vmul.f32 %v1895_v52, %v278_v3  ;;  %v514_v3 = vld [vmem:[%s2061_s3 + $0x28] sm:$0xff] }
  0xd0   :  { %v323_v34 = vpop.permute.xlu1 %322 }
  0xd1   :  { %v339_v56 = vmul.f32 %v1827_v13, %v323_v34  ;;  %v1204_v34 = vld [vmem:[%s2061_s3 + $0x40] sm:$0xff] }
  0xd2   :  { %1344 = vmatprep.mubr.msk.f32.mxu1 %vm565_vm9, %v1204_v34 }
  0xd3   :  { %v347_v51 = vadd.f32 %v339_v56, %v295_v58 }
  0xd4   :  { %v327_v39 = vpop.permute.xlu1 %326 }
  0xd5   :  { %v340_v6 = vmul.f32 %v1827_v13, %v327_v39 }
  0xd7   :  { %v348_v22 = vadd.f32 %v340_v6, %v296_v18  ;;  %v1206_v18 = vld [vmem:[%s2061_s3 + $0x50] sm:$0xff]  ;;  %v1207_v6 = vld [vmem:[%s2061_s3 + $0x58] sm:$0xff] }
  0xd9   :  { %v423_v15 = vpop.permute.xlu1 %422 }
  0xda   :  { %v442_v1 = vmul.f32 %v1876_v45, %v423_v15 }
  0xdc   :  { %v450_v17 = vadd.f32 %v442_v1, %v398_v4 }
  0xde   :  { %v474_v54 = vpop.permute.xlu1 %473  ;;  %v506_v20 = vadd.f32 %v489_v62, %v450_v17  ;;  %v1205_v17 = vld [vmem:[%s2061_s3 + $0x48] sm:$0xff]  ;;  %v1208_v62 = vld [vmem:[%s2061_s3 + $0x60] sm:$0xff] }
  0xdf   :  { %v503_v55 = vadd.f32 %v474_v54, %v447_v53 }
  0xe1   :  { %v1388_v32 = vpack.c.bf16 %v504_v38, %v503_v55 }
  0xe3   :  { %v375_v41 = vpop.permute.xlu1 %374  ;;  %1389 = vmatprep.subr.bf16.mxu0 %v1388_v32 }
  0xe4   :  { %v391_v60 = vmul.f32 %v1856_v30, %v375_v41  ;;  %1391 = vmatpush3.bf16.msra.mxu0 %v1388_v32  ;;  %v558_v32 = vpop.permute.xlu0 %557 }
  0xe6   :  { %v399_v63 = vadd.f32 %v391_v60, %v347_v51 }
  0xe7   :  { %v379_v0 = vpop.permute.xlu1 %378 }
  0xe8   :  { %v451_v2 = vadd.f32 %v1883_v49, %v399_v63  ;;  %v392_v9 = vmul.f32 %v1856_v30, %v379_v0  ;;  %v510_v30 = vld [vmem:[%s2061_s3 + $0x8] sm:$0xff] }
  0xea   :  { %v400_v25 = vadd.f32 %v392_v9, %v348_v22  ;;  %v1210_v9 = vld [vmem:[%s2061_s3 + $0x70] sm:$0xff]  ;;  %v1232_v22 = vld [vmem:[%s2061_s3 + $0xa0] sm:$0xff] }
  0xec   :  { %v431_v16 = vpop.permute.xlu1 %430 }
  0xed   :  { %v444_v49 = vmul.f32 %v1876_v45, %v431_v16  ;;  %v511_v45 = vld [vmem:[%s2061_s3 + $0x10] sm:$0xff] }
  0xef   :  { %v452_v28 = vadd.f32 %v444_v49, %v400_v25 }
  0xf1   :  { %v484_v19 = vpop.permute.xlu1 %483 }
  0xf2   :  { %v505_v57 = vadd.f32 %v484_v19, %v1906_v61  ;;  %v512_v61 = vld [vmem:[%s2061_s3 + $0x18] sm:$0xff]  ;;  %v1209_v19 = vld [vmem:[%s2061_s3 + $0x68] sm:$0xff] }
  0xf4   :  { %v1392_v23 = vpack.c.bf16 %v506_v20, %v505_v57  ;;  %v1211_v57 = vld [vmem:[%s2061_s3 + $0x78] sm:$0xff]  ;;  %v1228_v20 = vld [vmem:[%s2061_s3 + $0x80] sm:$0xff] }
  0xf5   :  { %v494_v24 = vpop.permute.xlu1 %493 }
  0xf6   :  { %1393 = vmatprep.subr.bf16.mxu0 %v1392_v23  ;;  %v507_v52 = vadd.f32 %v494_v24, %v451_v2 }
  0xf7   :  { %1395 = vmatpush3.bf16.msra.mxu0 %v1392_v23  ;;  %v724_v23 = vpop.permute.xlu0 %723 }
  0xf9   :  { %v499_v29 = vpop.permute.xlu1 %498 }
  0xfa   :  { %v508_v21 = vadd.f32 %v499_v29, %v452_v28 }
  0xfb   :  { %v734_v28 = vpop.permute.xlu0 %733 }
  0xfc   :  { %v1396_v13 = vpack.c.bf16 %v508_v21, %v507_v52 }
  0xfd   :  { %v533_v35 = vpop.permute.xlu1 %532 }
  0xfe   :  { %1397 = vmatprep.subr.bf16.mxu0 %v1396_v13 }
  0xff   :  { %1399 = vmatpush3.bf16.msra.mxu0 %v1396_v13 }
 0x101   :  { %v543_v37 = vpop.permute.xlu1 %542 }
 0x102   :  { %1317 = vmatmul.mubr.msk.f32.vlgmr.msra.gmra.mrb[0].mxu0 %vm565_vm9, %v510_v30 }
 0x103   :  { %1319 = vmatprep.mubr.msk.f32.mxu0 %vm565_vm9, %v511_v45 }
 0x105   :  { %v553_v42 = vpop.permute.xlu1 %552 }
 0x106   :  { %1320 = vmatmul.mubr.msk.f32.gmra.mrb[2].mxu0 %vm565_vm9, %v512_v61 }
 0x107   :  { %1322 = vmatprep.mubr.msk.f32.mxu0 %vm565_vm9, %v513_v31 }
 0x109   :  { %v563_v38 = vpop.permute.xlu1 %562 }
 0x10a   :  { %1323 = vmatmul.mubr.msk.f32.gmra.mrb[4].mxu0 %vm565_vm9, %v514_v3  ;;  %v744_v3 = vpop.permute.xlu0 %743 }
 0x10b   :  { %1325 = vmatprep.mubr.msk.f32.mxu0 %vm565_vm9, %v515_v33 }
 0x10d   :  { %v729_v49 = vpop.permute.xlu1 %728 }
 0x10e   :  { %1326 = vmatmul.mubr.msk.f32.gmra.mrb[6].mxu0 %vm565_vm9, %v516_v26 }
 0x10f   :  { %1372 = vmatprep.mubr.msk.f32.mxu0 %vm565_vm9, %v1228_v20 }
 0x111   :  { %v739_v24 = vpop.permute.xlu1 %738 }
 0x115   :  { %v749_v61 = vpop.permute.xlu1 %748 }
 0x1d5   :  { %v1318_v39 = vpop.f32.mrb[0].mxu0 }
 0x1d6   :  { %v662_v44 = vadd.f32 %v1318_v39, %v533_v35  ;;  %v656_v46 = vpop.f32.mrb[1].mxu0 }
 0x1d7   :  { %v657_v47 = vadd.f32 %v656_v46, %v528_v36  ;;  %v759_v36 = vpop.permute.xlu1 %758 }
 0x1d8   :  { %1481 = vtanh.f32 %v662_v44 }
 0x1d9   :  { %1483 = vtanh.f32 %v657_v47  ;;  %v1321_v48 = vpop.f32.mrb[2].mxu0 }
 0x1da   :  { %v672_v5 = vadd.f32 %v1321_v48, %v543_v37  ;;  %v666_v43 = vpop.f32.mrb[3].mxu0 }
 0x1db   :  { %v667_v15 = vadd.f32 %v666_v43, %v538_v40  ;;  %v754_v40 = vpop.permute.xlu0 %753 }
 0x1dc   :  { %1485 = vtanh.f32 %v672_v5 }
 0x1dd   :  { %1487 = vtanh.f32 %v667_v15  ;;  %v1324_v12 = vpop.f32.mrb[4].mxu0 }
 0x1de   :  { %v682_v11 = vadd.f32 %v1324_v12, %v553_v42  ;;  %v676_v53 = vpop.f32.mrb[5].mxu0 }
 0x1df   :  { %v677_v54 = vadd.f32 %v676_v53, %v548_v27 }
 0x1e0   :  { %1489 = vtanh.f32 %v682_v11 }
 0x1e1   :  { %1491 = vtanh.f32 %v677_v54  ;;  %v1327_v55 = vpop.f32.mrb[6].mxu0 }
 0x1e2   :  { %v1482_v56 = vpop.eup %1481  ;;  %v692_v58 = vadd.f32 %v1327_v55, %v563_v38  ;;  %v686_v41 = vpop.f32.mrb[7].mxu0  ;;  %v1229_v55 = vld [vmem:[%s2061_s3 + $0x88] sm:$0xff] }
 0x1e3   :  { %v1484_v51 = vpop.eup %1483  ;;  %v687_v60 = vadd.f32 %v686_v41, %v558_v32  ;;  %v1230_v32 = vld [vmem:[%s2061_s3 + $0x90] sm:$0xff]  ;;  %v1231_v41 = vld [vmem:[%s2061_s3 + $0x98] sm:$0xff] }
 0x1e4   :  { %1493 = vtanh.f32 %v692_v58  ;;  %v1400_v7 = vpack.c.bf16 %v1482_v56, %v1484_v51  ;;  %v1233_v56 = vld [vmem:[%s2061_s3 + $0xa8] sm:$0xff]  ;;  %v1234_v58 = vld [vmem:[%s2061_s3 + $0xb0] sm:$0xff]  ;;  %v1235_v51 = vld [vmem:[%s2061_s3 + $0xb8] sm:$0xff]  ;;  %s1563_s3 = smov [#allocation3]  }
 0x1e5   :  { %1495 = vtanh.f32 %v687_v60  ;;  %v919_v60 = vpop.permute.xlu0 %918  ;;  %s1180_s11 = sshll.u32 %s1563_s3, 4  ;;  %s1181_s11 = int_to_ptr.vmem [resolvable:$true] %s1180_s11 }
 0x1e6   :  { %v1486_v63 = vpop.eup %1485  ;;  %1401 = vmatprep.subr.bf16.mxu1 %v1400_v7  ;;  %s1529_s12 = scalar_lea.vmem %s1181_s11, 16  ;;  %s1533_s13 = scalar_lea.vmem %s1181_s11, 32 }
 0x1e7   :  { %v1488_v0 = vpop.eup %1487  ;;  %1403 = vmatpush3.bf16.msra.mxu1 %v1400_v7  ;;  %v924_v7 = vpop.permute.xlu1 %923  ;;  %p1530_p0 = scmp.ne.s32.totalorder %s1181_s11, %s1529_s12  ;;  %p1534_p1 = scmp.lt.s32.totalorder %s1181_s11, %s1181_s11 }
 0x1e8   :  { %v1404_v8 = vpack.c.bf16 %v1486_v63, %v1488_v0  ;;  %p1535_p2 = scmp.lt.s32.totalorder %s1533_s13, %s1529_s12 }
 0x1e9   :  { %v929_v63 = vpop.permute.xlu0 %928 }
 0x1ea   :  { %v1490_v10 = vpop.eup %1489  ;;  %1405 = vmatprep.subr.bf16.mxu1 %v1404_v8  ;;  %p1536_p3 = por %p1535_p2, %p1534_p1 }
 0x1eb   :  { %v1492_v2 = vpop.eup %1491  ;;  %1407 = vmatpush3.bf16.msra.mxu1 %v1404_v8  ;;  %v934_v0 = vpop.permute.xlu1 %933 }
 0x1ec   :  { %v1408_v14 = vpack.c.bf16 %v1490_v10, %v1492_v2  ;;  %p1537_p4 = pnand %p1536_p3, %p1530_p0 }
 0x1ed   :  { %v939_v8 = vpop.permute.xlu0 %938 }
 0x1ee   :  { %v1494_v1 = vpop.eup %1493  ;;  %1409 = vmatprep.subr.bf16.mxu1 %v1408_v14 }
 0x1ef   :  { %v1496_v4 = vpop.eup %1495  ;;  %1411 = vmatpush3.bf16.msra.mxu1 %v1408_v14  ;;  %v944_v10 = vpop.permute.xlu1 %943 }
 0x1f0   :  { %v1412_v16 = vpack.c.bf16 %v1494_v1, %v1496_v4 }
 0x1f2   :  { %1413 = vmatprep.subr.bf16.mxu1 %v1412_v16 }
 0x1f3   :  { %1415 = vmatpush3.bf16.msra.mxu1 %v1412_v16 }
 0x1f6   :  { %1345 = vmatmul.mubr.msk.f32.vlgmr.msra.gmra.mrb[0].mxu1 %vm565_vm9, %v1205_v17 }
 0x1f7   :  { %1347 = vmatprep.mubr.msk.f32.mxu1 %vm565_vm9, %v1206_v18  ;;  %v949_v18 = vpop.permute.xlu0 %948 }
 0x1fa   :  { %1348 = vmatmul.mubr.msk.f32.gmra.mrb[2].mxu1 %vm565_vm9, %v1207_v6  ;;  %v954_v6 = vpop.permute.xlu1 %953 }
 0x1fb   :  { %1350 = vmatprep.mubr.msk.f32.mxu1 %vm565_vm9, %v1208_v62 }
 0x1fe   :  { %1351 = vmatmul.mubr.msk.f32.gmra.mrb[4].mxu1 %vm565_vm9, %v1209_v19 }
 0x1ff   :  { %1353 = vmatprep.mubr.msk.f32.mxu1 %vm565_vm9, %v1210_v9 }
 0x202   :  { %1354 = vmatmul.mubr.msk.f32.gmra.mrb[6].mxu1 %vm565_vm9, %v1211_v57 }
 0x203   :  { %1378 = vmatprep.mubr.msk.f32.mxu1 %vm565_vm9, %v1232_v22 }
 0x2c9   :  { %v1346_v25 = vpop.f32.mrb[0].mxu1 }
 0x2ca   :  { %v857_v29 = vadd.f32 %v1346_v25, %v729_v49  ;;  %v851_v52 = vpop.f32.mrb[1].mxu1  ;;  %v1109_v25 = vpop.permute.xlu1 %1108 }
 0x2cb   :  { %v852_v21 = vadd.f32 %v851_v52, %v724_v23  ;;  %v1104_v23 = vpop.permute.xlu0 %1103 }
 0x2cc   :  { %1497 = vtanh.f32 %v857_v29 }
 0x2cd   :  { %1499 = vtanh.f32 %v852_v21  ;;  %v1349_v13 = vpop.f32.mrb[2].mxu1 }
 0x2ce   :  { %v867_v30 = vadd.f32 %v1349_v13, %v739_v24  ;;  %v861_v45 = vpop.f32.mrb[3].mxu1 }
 0x2cf   :  { %v862_v31 = vadd.f32 %v861_v45, %v734_v28 }
 0x2d0   :  { %1501 = vtanh.f32 %v867_v30  ;;  %v1114_v30 = vpop.permute.xlu0 %1113 }
 0x2d1   :  { %1503 = vtanh.f32 %v862_v31  ;;  %v1352_v33 = vpop.f32.mrb[4].mxu1 }
 0x2d2   :  { %v877_v26 = vadd.f32 %v1352_v33, %v749_v61  ;;  %v871_v34 = vpop.f32.mrb[5].mxu1  ;;  %v1119_v61 = vpop.permute.xlu1 %1118 }
 0x2d3   :  { %v872_v35 = vadd.f32 %v871_v34, %v744_v3 }
 0x2d4   :  { %1505 = vtanh.f32 %v877_v26 }
 0x2d5   :  { %1507 = vtanh.f32 %v872_v35  ;;  %v1355_v37 = vpop.f32.mrb[6].mxu1  ;;  %v1124_v35 = vpop.permute.xlu0 %1123 }
 0x2d6   :  { %v1498_v39 = vpop.eup %1497  ;;  %v887_v44 = vadd.f32 %v1355_v37, %v759_v36  ;;  %v881_v46 = vpop.f32.mrb[7].mxu1 }
 0x2d7   :  { %v1500_v47 = vpop.eup %1499  ;;  %v882_v48 = vadd.f32 %v881_v46, %v754_v40  ;;  %v1129_v40 = vpop.permute.xlu1 %1128 }
 0x2d8   :  { %1509 = vtanh.f32 %v887_v44  ;;  %v1416_v5 = vpack.c.bf16 %v1498_v39, %v1500_v47 }
 0x2d9   :  { %1511 = vtanh.f32 %v882_v48 }
 0x2da   :  { %v1502_v43 = vpop.eup %1501  ;;  %1417 = vmatprep.subr.bf16.mxu0 %v1416_v5  ;;  %1432 = vmatprep.subr.bf16.mxu1 %v1416_v5 }
 0x2db   :  { %v1504_v42 = vpop.eup %1503  ;;  %1419 = vmatpush3.bf16.msra.mxu0 %v1416_v5  ;;  %1436 = vmatpush3.bf16.msra.mxu1 %v1416_v5 }
 0x2dc   :  { %v1420_v15 = vpack.c.bf16 %v1502_v43, %v1504_v42  ;;  %v1134_v42 = vpop.permute.xlu0 %1133 }
 0x2de   :  { %v1506_v27 = vpop.eup %1505  ;;  %1421 = vmatprep.subr.bf16.mxu0 %v1420_v15  ;;  %1433 = vmatprep.subr.bf16.mxu1 %v1420_v15 }
 0x2df   :  { %v1508_v12 = vpop.eup %1507  ;;  %1423 = vmatpush3.bf16.msra.mxu0 %v1420_v15  ;;  %1437 = vmatpush3.bf16.msra.mxu1 %v1420_v15 }
 0x2e0   :  { %v1424_v11 = vpack.c.bf16 %v1506_v27, %v1508_v12  ;;  %v1139_v12 = vpop.permute.xlu1 %1138 }
 0x2e2   :  { %v1510_v53 = vpop.eup %1509  ;;  %1425 = vmatprep.subr.bf16.mxu0 %v1424_v11  ;;  %1434 = vmatprep.subr.bf16.mxu1 %v1424_v11 }
 0x2e3   :  { %v1512_v54 = vpop.eup %1511  ;;  %1427 = vmatpush3.bf16.msra.mxu0 %v1424_v11  ;;  %1438 = vmatpush3.bf16.msra.mxu1 %v1424_v11 }
 0x2e4   :  { %v1428_v38 = vpack.c.bf16 %v1510_v53, %v1512_v54 }
 0x2e6   :  { %1429 = vmatprep.subr.bf16.mxu0 %v1428_v38  ;;  %1435 = vmatprep.subr.bf16.mxu1 %v1428_v38 }
 0x2e7   :  { %1431 = vmatpush3.bf16.msra.mxu0 %v1428_v38  ;;  %1439 = vmatpush3.bf16.msra.mxu1 %v1428_v38 }
 0x2ea   :  { %1373 = vmatmul.mubr.msk.f32.vlgmr.msra.gmra.mrb[8].mxu0 %vm565_vm9, %v1229_v55  ;;  %1379 = vmatmul.mubr.msk.f32.vlgmr.msra.gmra.mrb[8].mxu1 %vm565_vm9, %v1233_v56 }
 0x2eb   :  { %1375 = vmatprep.mubr.msk.f32.mxu0 %vm565_vm9, %v1230_v32  ;;  %1381 = vmatprep.mubr.msk.f32.mxu1 %vm565_vm9, %v1234_v58  ;;  %v1166_v58 = vpop.permute.xlu0 %1165 }
 0x2ee   :  { %1376 = vmatmul.mubr.msk.f32.gmra.mrb[10].mxu0 %vm565_vm9, %v1231_v41  ;;  %1382 = vmatmul.mubr.msk.f32.gmra.mrb[10].mxu1 %vm565_vm9, %v1235_v51  ;;  %v1171_v51 = vrot.slane %v1166_v58, %v287_v50 }
 0x3bd   :  { %v1374_v2 = vpop.f32.mrb[8].mxu0  ;;  %v1380_v14 = vpop.f32.mrb[8].mxu1 }
 0x3be   :  { %v1052_v1 = vadd.f32 %v1374_v2, %v924_v7  ;;  %v1046_v4 = vpop.f32.mrb[9].mxu0  ;;  %v1066_v16 = vpop.f32.mrb[9].mxu1  ;;  %v1072_v24 = vadd.f32 %v1380_v14, %v944_v10 }
 0x3bf   :  { %v1047_v17 = vadd.f32 %v1046_v4, %v919_v60  ;;  %v1067_v49 = vadd.f32 %v1066_v16, %v939_v8 }
 0x3c0   :  { %1513 = vtanh.f32 %v1052_v1 }
 0x3c1   :  { %v1377_v62 = vpop.f32.mrb[10].mxu0  ;;  %v1383_v19 = vpop.f32.mrb[10].mxu1  ;;  %1515 = vtanh.f32 %v1047_v17 }
 0x3c2   :  { %v1062_v9 = vadd.f32 %v1377_v62, %v934_v0  ;;  %v1056_v57 = vpop.f32.mrb[11].mxu0  ;;  %v1076_v20 = vpop.f32.mrb[11].mxu1  ;;  %v1082_v52 = vadd.f32 %v1383_v19, %v954_v6 }
 0x3c3   :  { %v1057_v22 = vadd.f32 %v1056_v57, %v929_v63  ;;  %v1077_v28 = vadd.f32 %v1076_v20, %v949_v18 }
 0x3c4   :  { %1517 = vtanh.f32 %v1062_v9 }
 0x3c5   :  { %1519 = vtanh.f32 %v1057_v22 }
 0x3c6   :  { %1521 = vtanh.f32 %v1067_v49 }
 0x3c7   :  { %1523 = vtanh.f32 %v1072_v24 }
 0x3c8   :  { %1525 = vtanh.f32 %v1077_v28 }
 0x3c9   :  { %1527 = vtanh.f32 %v1082_v52 }
 0x3ca   :  { %v1514_v29 = vpop.eup %1513 }
 0x3cb   :  { %v1142_v21 = vmul.f32 %v1514_v29, %v1109_v25  ;;  %v1516_v13 = vpop.eup %1515 }
 0x3cc   :  { %v1141_v45 = vmul.f32 %v1516_v13, %v1104_v23 }
 0x3ce   :  { %v1518_v31 = vpop.eup %1517  ;;  %v1149_v3 = vadd.f32 %v1142_v21, %v1141_v45 }
 0x3cf   :  { %v1520_v33 = vpop.eup %1519  ;;  %v1144_v36 = vmul.f32 %v1518_v31, %v1119_v61 }
 0x3d0   :  { %v1143_v26 = vmul.f32 %v1520_v33, %v1114_v30  ;;  %v1522_v34 = vpop.eup %1521 }
 0x3d1   :  { %v1524_v39 = vpop.eup %1523  ;;  %v1145_v44 = vmul.f32 %v1522_v34, %v1124_v35 }
 0x3d2   :  { %v1150_v37 = vadd.f32 %v1149_v3, %v1143_v26  ;;  %v1526_v47 = vpop.eup %1525  ;;  %v1146_v48 = vmul.f32 %v1524_v39, %v1129_v40 }
 0x3d3   :  { %v1528_v43 = vpop.eup %1527  ;;  %v1147_v15 = vmul.f32 %v1526_v47, %v1134_v42 }
 0x3d4   :  { %v1151_v46 = vadd.f32 %v1150_v37, %v1144_v36  ;;  %v1148_v11 = vmul.f32 %v1528_v43, %v1139_v12 }
 0x3d6   :  { %v1152_v5 = vadd.f32 %v1151_v46, %v1145_v44 }
 0x3d8   :  { %v1153_v27 = vadd.f32 %v1152_v5, %v1146_v48 }
 0x3da   :  { %v1154_v53 = vadd.f32 %v1153_v27, %v1147_v15 }
 0x3dc   :  { %v1155_v54 = vadd.f32 %v1154_v53, %v1148_v11 }
 0x3de   :  { %v1156_v38 = vrot.slane %v1155_v54, 4 }
 0x3e0   :  { %v1157_v55 = vadd.f32 %v1156_v38, %v1155_v54 }
 0x3e2   :  { %v1158_v56 = vrot.slane %v1157_v55, 2 }
 0x3e4   :  { %v1159_v32 = vadd.f32 %v1158_v56, %v1157_v55 }
 0x3e6   :  { %v1160_v41 = vrot.slane %v1159_v32, 1 }
 0x3e8   :  { %v1161_v60 = vadd.f32 %v1160_v41, %v1159_v32 }
 0x3ea   :  { %v1172_v7 = vadd.f32 %v1171_v51, %v1161_v60 }
 0x3ec   :  { %1173 = vst [vmem:[#allocation3] sm:$0x1] %v1172_v7 }
 0x3ed   :  { %1540 = shalt.err (!%p1537_p4)
}
 0x3ee   :  { %s1541_s15 = scalar_lea.hbm %s2065_s7, 16 }
 0x3ef   :  { %p1542_p5 = scmp.ne.s32.totalorder %s2065_s7, %s1541_s15  ;;  %p1545_p6 = scmp.lt.u32.totalorder %s1541_s15, %s2065_s7 }
 0x3f1   :  { %p1547_p7 = pnand %p1545_p6, %p1542_p5 }
 0x3f3   :  { %1550 = shalt.err (!%p1547_p7)
}
 0x3f4   :  { %1183 = dma.vmem_to_hbm [thread:$0]  %s1181_s11, 16, %s2065_s7, [#allocation4]  }
 0x3f5   :  { %1551 = dma.done.wait [#allocation4], 16  }
 0x3f6   :  { %1552 = vsyncadd [#allocation4], 4294967280 }
 0x3f7   :  { %1187 = vsyncpa [#allocation4], 1 }

</bundles_post_ra>
